<compile_context>
chip_gen: v7x
topology: tpu7x:2x2x1
jax: 0.10.0
libtpu: 0.0.40
codegen_flags: <defaults>
</compile_context>

<pallas_src>
import functools

import jax
import jax.numpy as jnp
from jax.experimental import pallas as pl
from jax.experimental.pallas import tpu as pltpu


def _round_up(x, m):
    return ((x + m - 1) // m) * m


def _embed_kernel(tokens_ref, w_ref, add_ref, out_ref, *, tb, t_pad, n_tokens):
    # tokens_ref: (tb, Tpad, Kp)  row0 = zeros (CLS slot), rows 1..P = patches, rest zeros
    # w_ref:      (Kp, Hp)        flattened conv weight
    # add_ref:    (1, Tpad, Hp)   row0 = cls+pos[0], rows 1..P = pos[1:]+bias, rest zeros
    # out_ref:    (tb, n_tokens, Hp)  with n_tokens = P + 1
    kp = tokens_ref.shape[-1]
    hp = w_ref.shape[-1]

    x = tokens_ref[...].reshape(tb * t_pad, kp)          # t_pad % 8 == 0 -> layout-free collapse
    proj = jnp.dot(x, w_ref[...], preferred_element_type=jnp.float32)   # (tb*Tpad, Hp) f32 acc
    full = proj.reshape(tb, t_pad, hp) + add_ref[...]                    # (tb, Tpad, Hp)

    # Single aligned store starting at token 0; only the final sublane tile is masked.
    out_ref[...] = full[:, :n_tokens, :].astype(out_ref.dtype)


def _tpu_vmem_and_cores():
    """Best-effort query of per-core VMEM capacity and TensorCore count."""
    vmem_cap = 128 * 1024 * 1024
    num_cores = 1
    try:
        info = pltpu.get_tpu_info()
        cap = getattr(info, "vmem_capacity_bytes", None)
        if isinstance(cap, int) and cap > 0:
            vmem_cap = cap
        for attr in ("num_cores", "core_count", "num_tensorcores", "tensorcore_count"):
            v = getattr(info, attr, None)
            if isinstance(v, int) and v > 0:
                num_cores = v
                break
    except Exception:
        pass
    return vmem_cap, num_cores


def _resident_spec(block_shape, index_map):
    """Constant-index operand: request single buffering; fall back if unsupported."""
    try:
        return pl.BlockSpec(block_shape, index_map, pipeline_mode=pl.Buffered(1))
    except Exception:
        return pl.BlockSpec(block_shape, index_map)


def _pick_batch_tile(B, t_pad, n_tokens, Kp, Hp, in_itemsize, out_itemsize,
                     *, max_tb, vmem_budget, num_cores):
    """Largest divisor of B (<= max_tb) that fits the VMEM budget.  Only enforce
    >= num_cores grid steps when the chip actually has multiple TensorCores."""
    def est(t):
        return (2 * t * t_pad * Kp * in_itemsize          # tokens (double-buffered)
                + Kp * Hp * in_itemsize                   # weight (resident)
                + t_pad * Hp * 4                          # fused add (resident, f32)
                + 2 * t * n_tokens * Hp * out_itemsize)   # output (double-buffered)

    best = 1
    for t in range(min(max_tb, B), 0, -1):
        if B % t != 0:
            continue
        if est(t) > vmem_budget:
            continue
        if num_cores > 1 and t > 1 and (B // t) < num_cores:
            continue
        best = t
        break
    return best


def mgpstr_embeddings(pixel_values, proj_weight, proj_bias, cls_token, pos_embed,
                      *, patch_size, compute_dtype=jnp.bfloat16, out_dtype=None,
                      max_batch_tile=8):
    """pixel_values: (B, C, H, W) NCHW; proj_weight: (hidden, C, ph, pw) torch layout;
    proj_bias: (hidden,); cls_token: (1, 1, hidden); pos_embed: (1, P+1, hidden).
    Returns (B, P+1, hidden) embeddings in `out_dtype` (default: pixel dtype)."""
    B, C, H, W = pixel_values.shape
    ph, pw = patch_size
    gh, gw = H // ph, W // pw
    P = gh * gw
    hidden = proj_weight.shape[0]
    K = C * ph * pw
    n_tokens = P + 1
    out_dtype = pixel_values.dtype if out_dtype is None else out_dtype

    # Lane/sublane-friendly padded dims.
    Kp = max(128, _round_up(K, 128))
    Hp = max(128, _round_up(hidden, 128))
    t_pad = max(8, _round_up(n_tokens, 8))     # CLS row + P patches, padded to x8

    # --- glue: patch extraction (cast first so the materialized buffer is compute_dtype) ---
    px = pixel_values.astype(compute_dtype)
    patches = px.reshape(B, C, gh, ph, gw, pw)
    patches = patches.transpose(0, 2, 4, 1, 3, 5).reshape(B, P, K)     # (B, P, K), order (c, kh, kw)
    # One pad: zero CLS row in front, zero tail rows to t_pad, zero K columns to Kp.
    tokens = jnp.pad(patches, ((0, 0), (1, t_pad - 1 - P), (0, Kp - K)))

    # conv weight flattened exactly like torch: (hidden, C*ph*pw) -> (K, hidden) -> padded
    w = proj_weight.reshape(hidden, K).T
    w = jnp.pad(w, ((0, Kp - K), (0, Hp - hidden))).astype(compute_dtype)

    # --- pre-fused additive terms, one (1, Tpad, Hp) tensor ---
    cls_row = (cls_token + pos_embed[:, :1, :]).astype(jnp.float32)                    # (1, 1, hidden)
    body_add = (pos_embed[:, 1:, :] + proj_bias[None, None, :]).astype(jnp.float32)    # (1, P, hidden)
    add_full = jnp.concatenate([cls_row, body_add], axis=1)                            # (1, P+1, hidden)
    add_full = jnp.pad(add_full, ((0, 0), (0, t_pad - n_tokens), (0, Hp - hidden)))

    # --- generation-aware tiling ---
    vmem_cap, num_cores = _tpu_vmem_and_cores()
    vmem_budget = int(0.375 * vmem_cap)
    vmem_limit = int(0.70 * vmem_cap)
    tb = _pick_batch_tile(B, t_pad, n_tokens, Kp, Hp,
                          jnp.dtype(compute_dtype).itemsize,
                          jnp.dtype(out_dtype).itemsize,
                          max_tb=max_batch_tile, vmem_budget=vmem_budget,
                          num_cores=num_cores)
    n_steps = B // tb       # tb divides B -> no batch padding, no trailing batch slice

    grid_spec = pltpu.PrefetchScalarGridSpec(
        num_scalar_prefetch=0,
        grid=(n_steps,),
        in_specs=[
            pl.BlockSpec((tb, t_pad, Kp), lambda i: (i, 0, 0)),      # tokens (per-step DMA)
            _resident_spec((Kp, Hp), lambda i: (0, 0)),              # weight (resident)
            _resident_spec((1, t_pad, Hp), lambda i: (0, 0, 0)),     # fused pos/bias/cls add
        ],
        out_specs=pl.BlockSpec((tb, n_tokens, Hp), lambda i: (i, 0, 0)),
    )

    out = pl.pallas_call(
        functools.partial(_embed_kernel, tb=tb, t_pad=t_pad, n_tokens=n_tokens),
        out_shape=jax.ShapeDtypeStruct((B, n_tokens, Hp), out_dtype),
        grid_spec=grid_spec,
        compiler_params=pltpu.CompilerParams(
            dimension_semantics=("parallel",),
            vmem_limit_bytes=vmem_limit,
        ),
    )(tokens, w, add_full)

    if Hp != hidden:
        out = out[:, :, :hidden]
    return out


def _reference(pixel_values, proj_weight, proj_bias, cls_token, pos_embed, *, patch_size):
    """Pure-JAX f32 reference mirroring the PyTorch forward (conv -> flatten -> cat -> add)."""
    B = pixel_values.shape[0]
    out = jax.lax.conv_general_dilated(
        pixel_values, proj_weight,
        window_strides=patch_size, padding="VALID",
        dimension_numbers=("NCHW", "OIHW", "NCHW"),
    ) + proj_bias[None, :, None, None]
    patch_emb = out.reshape(B, out.shape[1], -1).transpose(0, 2, 1)   # flatten(2).transpose(1,2)
    cls = jnp.broadcast_to(cls_token, (B, 1, cls_token.shape[-1]))
    emb = jnp.concatenate([cls, patch_emb], axis=1) + pos_embed
    return emb


if __name__ == "__main__":
    # Small config: image 16x16, patch 4x4, 4 channels, hidden 32, batch 2, not distilled.
    batch, channels, image_size, patch, hidden = 2, 4, 16, 4, 32
    grid = image_size // patch
    num_patches = grid * grid          # 16
    num_tokens = 1                     # distilled = False

    key = jax.random.PRNGKey(0)
    k1, k2, k3, k4, k5 = jax.random.split(key, 5)

    pixel_values = jax.random.normal(k1, (batch, channels, image_size, image_size),
                                     dtype=jnp.float32)
    proj_weight = 0.1 * jax.random.normal(k2, (hidden, channels, patch, patch),
                                          dtype=jnp.float32)
    proj_bias = 0.1 * jax.random.normal(k3, (hidden,), dtype=jnp.float32)
    cls_token = 0.02 * jax.random.normal(k4, (1, 1, hidden), dtype=jnp.float32)
    pos_embed = 0.02 * jax.random.normal(k5, (1, num_patches + num_tokens, hidden),
                                         dtype=jnp.float32)

    ref = _reference(pixel_values, proj_weight, proj_bias, cls_token, pos_embed,
                     patch_size=(patch, patch))

    # f32 compute path: bit-accurate check vs the conv reference.
    out_f32 = mgpstr_embeddings(pixel_values, proj_weight, proj_bias, cls_token, pos_embed,
                                patch_size=(patch, patch), compute_dtype=jnp.float32)
    out_f32 = jax.block_until_ready(out_f32)
    assert out_f32.shape == (batch, num_patches + num_tokens, hidden), out_f32.shape
    assert jnp.allclose(out_f32, ref, atol=1e-5, rtol=1e-5), "f32 path mismatch vs reference"

    # default bf16-operand path (MXU perf path): loose tolerance vs f32 reference.
    out_bf16 = mgpstr_embeddings(pixel_values, proj_weight, proj_bias, cls_token, pos_embed,
                                 patch_size=(patch, patch))
    out_bf16 = jax.block_until_ready(out_bf16)
    assert out_bf16.shape == (batch, num_patches + num_tokens, hidden), out_bf16.shape
    assert jnp.allclose(out_bf16, ref, atol=3e-2, rtol=3e-2), "bf16 path mismatch vs reference"

    # bf16-output path (halves HBM writeback when the downstream encoder is bf16).
    out_b16o = mgpstr_embeddings(pixel_values, proj_weight, proj_bias, cls_token, pos_embed,
                                 patch_size=(patch, patch), out_dtype=jnp.bfloat16)
    out_b16o = jax.block_until_ready(out_b16o)
    assert out_b16o.dtype == jnp.bfloat16
    assert jnp.allclose(out_b16o.astype(jnp.float32), ref, atol=5e-2, rtol=5e-2), \
        "bf16-output path mismatch vs reference"

    print("KERNEL_OK")
</pallas_src>

<mosaic_0001>
module attributes {stable_mosaic.version = 11 : i64} {
  func.func @_embed_kernel(%arg0: i32, %arg1: memref<2x24x128xf32, #tpu.memory_space<vmem>>, %arg2: memref<128x128xf32, #tpu.memory_space<vmem>>, %arg3: memref<1x24x128xf32, #tpu.memory_space<vmem>>, %arg4: memref<2x17x128xf32, #tpu.memory_space<vmem>>) attributes {dimension_semantics = [#tpu.dimension_semantics<parallel>], iteration_bounds = array<i64: 1>, scalar_prefetch = 0 : i64, scratch_operands = 0 : i64, tpu.core_type = #tpu.core_type<tc>, window_params = [{transform_indices = @transform_0, window_bounds = array<i64: 2, 24, 128>}, {pipeline_mode = #tpu.pipeline_mode<synchronous>, transform_indices = @transform_1, window_bounds = array<i64: 128, 128>}, {pipeline_mode = #tpu.pipeline_mode<synchronous>, transform_indices = @transform_2, window_bounds = array<i64: 1, 24, 128>}, {transform_indices = @transform_3, window_bounds = array<i64: 2, 17, 128>}]} {
    %c0 = arith.constant 0 : index
    %c0_0 = arith.constant 0 : index
    %c0_1 = arith.constant 0 : index
    %0 = vector.load %arg1[%c0, %c0_0, %c0_1] : memref<2x24x128xf32, #tpu.memory_space<vmem>>, vector<2x24x128xf32>
    %1 = vector.shape_cast %0 : vector<2x24x128xf32> to vector<48x128xf32>
    %c0_2 = arith.constant 0 : index
    %c0_3 = arith.constant 0 : index
    %2 = vector.load %arg2[%c0_2, %c0_3] : memref<128x128xf32, #tpu.memory_space<vmem>>, vector<128x128xf32>
    %cst = arith.constant dense<0.000000e+00> : vector<48x128xf32>
    %3 = tpu.matmul %1, %2, %cst {dimension_numbers = #tpu.dot_dimension_numbers<[1], [0], [0], [1], [0, 0, 1, 1], [], []>} : vector<48x128xf32>, vector<128x128xf32>, vector<48x128xf32> -> vector<48x128xf32>
    %4 = vector.shape_cast %3 : vector<48x128xf32> to vector<2x24x128xf32>
    %c0_4 = arith.constant 0 : index
    %c0_5 = arith.constant 0 : index
    %c0_6 = arith.constant 0 : index
    %5 = vector.load %arg3[%c0_4, %c0_5, %c0_6] : memref<1x24x128xf32, #tpu.memory_space<vmem>>, vector<1x24x128xf32>
    %6 = vector.broadcast %5 : vector<1x24x128xf32> to vector<2x24x128xf32>
    %7 = arith.addf %4, %6 : vector<2x24x128xf32>
    %8 = vector.extract_strided_slice %7 {offsets = [0, 0, 0], sizes = [2, 17, 128], strides = [1, 1, 1]} : vector<2x24x128xf32> to vector<2x17x128xf32>
    %c0_7 = arith.constant 0 : index
    %c0_8 = arith.constant 0 : index
    %c0_9 = arith.constant 0 : index
    %9 = vector.load %arg4[%c0_7, %c0_8, %c0_9] : memref<2x17x128xf32, #tpu.memory_space<vmem>>, vector<2x17x128xf32>
    tpu.vector_store %arg4[%c0_7, %c0_8, %c0_9], %8 {strides = array<i32>} : memref<2x17x128xf32, #tpu.memory_space<vmem>>, vector<2x17x128xf32>,
    return
  }
  func.func @transform_0(%arg0: i32) -> (i32, i32, i32) {
    %c0_i32 = arith.constant 0 : i32
    %c0_i32_0 = arith.constant 0 : i32
    %c0_i32_1 = arith.constant 0 : i32
    return %arg0, %c0_i32, %c0_i32_0 : i32, i32, i32
  }
  func.func @transform_1(%arg0: i32) -> (i32, i32) {
    %c0_i32 = arith.constant 0 : i32
    %c0_i32_0 = arith.constant 0 : i32
    %c0_i32_1 = arith.constant 0 : i32
    return %c0_i32, %c0_i32_0 : i32, i32
  }
  func.func @transform_2(%arg0: i32) -> (i32, i32, i32) {
    %c0_i32 = arith.constant 0 : i32
    %c0_i32_0 = arith.constant 0 : i32
    %c0_i32_1 = arith.constant 0 : i32
    %c0_i32_2 = arith.constant 0 : i32
    return %c0_i32, %c0_i32_0, %c0_i32_1 : i32, i32, i32
  }
  func.func @transform_3(%arg0: i32) -> (i32, i32, i32) {
    %c0_i32 = arith.constant 0 : i32
    %c0_i32_0 = arith.constant 0 : i32
    %c0_i32_1 = arith.constant 0 : i32
    return %arg0, %c0_i32, %c0_i32_0 : i32, i32, i32
  }
}

</mosaic_0001>

<bundles_post_ra>
// kernel: tpu_custom_call.1
= control target key start
LH: loop header
LB: loop body
LE: loop exit
PB: predicated region body
PF: predicated region fallthrough
CT: control target
= control target key end

     0   :  { %8 = vsyncpa [#allocation3], 0  ;;  %s510_s0 = inlined_call_operand.hbm [shape: f32[2,24,128], index: 0, kind: input, shape index: {}]   ;;  %s511_s1 = inlined_call_operand.hbm [shape: f32[128,128], index: 1, kind: input, shape index: {}]   ;;  %s512_s2 = inlined_call_operand.hbm [shape: f32[1,24,128], index: 2, kind: input, shape index: {}]   ;;  %s513_s3 = inlined_call_operand.hbm [shape: f32[2,17,128], index: 3, kind: output, shape index: {}]  }
   0x1   :  { %9 = vsyncpa [#allocation6], 0 }
   0x2   :  { %10 = vsyncpa [#allocation4], 0  ;;  %s417_s12 = smov [#allocation5]   ;;  %s418_s14 = smov [#allocation2]  }
   0x3   :  { %s28_s13 = sshll.u32 %s417_s12, 4  ;;  %s16_s15 = sshll.u32 %s418_s14, 4  ;;  %s29_s13 = int_to_ptr.vmem [resolvable:$true] %s28_s13  ;;  %s443_s15 = int_to_ptr.vmem [resolvable:$true] %s16_s15 }
   0x4   :  { %s323_s18 = scalar_lea.hbm %s511_s1, 2048 }
   0x5   :  { %p324_p0 = scmp.ne.s32.totalorder %s511_s1, %s323_s18  ;;  %p327_p1 = scmp.lt.u32.totalorder %s323_s18, %s511_s1 }
   0x7   :  { %p329_p2 = pnand %p327_p1, %p324_p0 }
   0x9   :  { %332 = shalt.err (!%p329_p2)
}
   0xa   :  { %s333_s23 = scalar_lea.vmem %s29_s13, 2048  ;;  %p338_p4 = scmp.lt.s32.totalorder %s29_s13, %s29_s13 }
   0xb   :  { %p334_p3 = scmp.ne.s32.totalorder %s29_s13, %s333_s23  ;;  %p339_p5 = scmp.lt.s32.totalorder %s333_s23, %s333_s23 }
   0xd   :  { %p340_p6 = por %p339_p5, %p338_p4 }
   0xf   :  { %p341_p7 = pnand %p340_p6, %p334_p3 }
  0x11   :  { %344 = shalt.err (!%p341_p7)
}
  0x12   :  { %s419_s24 = smov 128   ;;  %s420_s25 = smov 8  }
  0x13   :  { %34 = dma.hbm_to_vmem [thread:$0]  %s511_s1, 2048, %s29_s13, [#allocation6], %s419_s24, %s419_s24, %s420_s25  }
  0x14   :  { %s345_s30 = scalar_lea.hbm %s510_s0, 768 }
  0x15   :  { %p346_p8 = scmp.ne.s32.totalorder %s510_s0, %s345_s30  ;;  %p349_p9 = scmp.lt.u32.totalorder %s345_s30, %s510_s0 }
  0x17   :  { %p351_p10 = pnand %p349_p9, %p346_p8 }
  0x19   :  { %354 = shalt.err (!%p351_p10)
}
  0x1a   :  { %s355_s8 = scalar_lea.vmem %s443_s15, 768  ;;  %p360_p12 = scmp.lt.s32.totalorder %s443_s15, %s443_s15 }
  0x1b   :  { %p356_p11 = scmp.ne.s32.totalorder %s443_s15, %s355_s8  ;;  %p361_p13 = scmp.lt.s32.totalorder %s355_s8, %s355_s8 }
  0x1d   :  { %p362_p0 = por %p361_p13, %p360_p12 }
  0x1f   :  { %p363_p1 = pnand %p362_p0, %p356_p11 }
  0x21   :  { %366 = shalt.err (!%p363_p1)
}
  0x22   :  { %22 = dma.hbm_to_vmem [thread:$0]  %s510_s0, 768, %s443_s15, [#allocation3], %s419_s24, %s419_s24, %s420_s25  }
  0x23   :  { %s421_s10 = smov [#allocation7]   ;;  %s367_s14 = scalar_lea.hbm %s512_s2, 384 }
  0x24   :  { %s40_s11 = sshll.u32 %s421_s10, 4  ;;  %p368_p2 = scmp.ne.s32.totalorder %s512_s2, %s367_s14  ;;  %s41_s11 = int_to_ptr.vmem [resolvable:$true] %s40_s11 }
  0x25   :  { %p371_p3 = scmp.lt.u32.totalorder %s367_s14, %s512_s2 }
  0x27   :  { %p373_p4 = pnand %p371_p3, %p368_p2 }
  0x29   :  { %376 = shalt.err (!%p373_p4)
}
  0x2a   :  { %s377_s20 = scalar_lea.vmem %s41_s11, 384  ;;  %p382_p6 = scmp.lt.s32.totalorder %s41_s11, %s41_s11 }
  0x2b   :  { %p378_p5 = scmp.ne.s32.totalorder %s41_s11, %s377_s20  ;;  %p383_p7 = scmp.lt.s32.totalorder %s377_s20, %s377_s20 }
  0x2d   :  { %p384_p8 = por %p383_p7, %p382_p6 }
  0x2f   :  { %p385_p9 = pnand %p384_p8, %p378_p5 }
  0x31   :  { %388 = shalt.err (!%p385_p9)
}
  0x32   :  { %46 = dma.hbm_to_vmem [thread:$0]  %s512_s2, 384, %s41_s11, [#allocation6], %s419_s24, %s419_s24, %s420_s25  }
  0x33   :  { %411 = dma.done.wait [#allocation3], 768  }
  0x34   :  { %412 = vsyncadd [#allocation3], 4294966528 }
  0x35   :  { %413 = dma.done.wait [#allocation6], 2432  }
  0x36   :  { %414 = vsyncadd [#allocation6], 4294964864  ;;  %v62_v0 = vld [vmem:[#allocation5] sm:$0xff]  ;;  %v63_v1 = vld [vmem:[#allocation5 + $0x8] sm:$0xff]  ;;  %s422_s2 = smov [#allocation8]  }
  0x37   :  { %v64_v2 = vld [vmem:[#allocation5 + $0x10] sm:$0xff]  ;;  %v269_v3 = vpack.c.bf16 %v63_v1, %v62_v0  ;;  %v65_v4 = vld [vmem:[#allocation5 + $0x18] sm:$0xff]  ;;  %v66_v6 = vld [vmem:[#allocation5 + $0x20] sm:$0xff]  ;;  %s193_s21 = sshll.u32 %s422_s2, 4  ;;  %s194_s21 = int_to_ptr.vmem [resolvable:$true] %s193_s21 }
  0x38   :  { %v273_v5 = vpack.c.bf16 %v65_v4, %v64_v2  ;;  %v67_v7 = vld [vmem:[#allocation5 + $0x28] sm:$0xff]  ;;  %v58_v9 = vld [vmem:[#allocation2 + $0x10] sm:$0xff]  ;;  %v68_v10 = vld [vmem:[#allocation5 + $0x30] sm:$0xff]  ;;  %s389_s22 = scalar_lea.vmem %s194_s21, 768  ;;  %p394_p11 = scmp.lt.s32.totalorder %s194_s21, %s194_s21 }
  0x39   :  { %301 = vmatprep.subr.bf16.mxu1 %v269_v3  ;;  %270 = vmatprep.subr.bf16.mxu0 %v269_v3  ;;  %v277_v8 = vpack.c.bf16 %v67_v7, %v66_v6  ;;  %v69_v11 = vld [vmem:[#allocation5 + $0x38] sm:$0xff]  ;;  %v56_v12 = vld [vmem:[#allocation2] sm:$0xff]  ;;  %v70_v14 = vld [vmem:[#allocation5 + $0x40] sm:$0xff]  ;;  %p390_p10 = scmp.ne.s32.totalorder %s194_s21, %s389_s22  ;;  %p395_p12 = scmp.lt.s32.totalorder %s389_s22, %s389_s22 }
  0x3a   :  { %309 = vmatpush3.bf16.msra.mxu1 %v269_v3  ;;  %272 = vmatpush3.bf16.msra.mxu0 %v269_v3  ;;  %v281_v13 = vpack.c.bf16 %v69_v11, %v68_v10  ;;  %v71_v15 = vld [vmem:[#allocation5 + $0x48] sm:$0xff]  ;;  %v72_v17 = vld [vmem:[#allocation5 + $0x50] sm:$0xff]  ;;  %v73_v18 = vld [vmem:[#allocation5 + $0x58] sm:$0xff] }
  0x3b   :  { %302 = vmatprep.subr.bf16.mxu1 %v273_v5  ;;  %274 = vmatprep.subr.bf16.mxu0 %v273_v5  ;;  %v285_v16 = vpack.c.bf16 %v71_v15, %v70_v14  ;;  %v289_v19 = vpack.c.bf16 %v73_v18, %v72_v17  ;;  %v74_v20 = vld [vmem:[#allocation5 + $0x60] sm:$0xff]  ;;  %v75_v21 = vld [vmem:[#allocation5 + $0x68] sm:$0xff]  ;;  %v76_v23 = vld [vmem:[#allocation5 + $0x70] sm:$0xff]  ;;  %p396_p13 = por %p395_p12, %p394_p11 }
  0x3c   :  { %263 = vmatprep.mubr.f32.mxu1 %v58_v9  ;;  %260 = vmatprep.mubr.f32.mxu0 %v56_v12  ;;  %v293_v22 = vpack.c.bf16 %v75_v21, %v74_v20  ;;  %v77_v24 = vld [vmem:[#allocation5 + $0x78] sm:$0xff]  ;;  %v59_v26 = vld [vmem:[#allocation2 + $0x18] sm:$0xff]  ;;  %v60_v28 = vld [vmem:[#allocation2 + $0x20] sm:$0xff] }
  0x3d   :  { %v297_v25 = vpack.c.bf16 %v77_v24, %v76_v23  ;;  %v57_v27 = vld [vmem:[#allocation2 + $0x8] sm:$0xff]  ;;  %v173_v30 = vld [vmem:[#allocation7] sm:$0xff]  ;;  %v174_v31 = vld [vmem:[#allocation7 + $0x8] sm:$0xff]  ;;  %p397_p0 = pnand %p396_p13, %p390_p10 }
  0x3e   :  { %310 = vmatpush3.bf16.msra.mxu1 %v273_v5  ;;  %276 = vmatpush3.bf16.msra.mxu0 %v273_v5  ;;  %v61_v29 = vld [vmem:[#allocation2 + $0x28] sm:$0xff]  ;;  %v175_v32 = vld [vmem:[#allocation7 + $0x10] sm:$0xff] }
  0x3f   :  { %303 = vmatprep.subr.bf16.mxu1 %v277_v8  ;;  %278 = vmatprep.subr.bf16.mxu0 %v277_v8 }
  0x42   :  { %311 = vmatpush3.bf16.msra.mxu1 %v277_v8  ;;  %280 = vmatpush3.bf16.msra.mxu0 %v277_v8 }
  0x43   :  { %304 = vmatprep.subr.bf16.mxu1 %v281_v13  ;;  %282 = vmatprep.subr.bf16.mxu0 %v281_v13 }
  0x46   :  { %312 = vmatpush3.bf16.msra.mxu1 %v281_v13  ;;  %284 = vmatpush3.bf16.msra.mxu0 %v281_v13 }
  0x47   :  { %305 = vmatprep.subr.bf16.mxu1 %v285_v16  ;;  %286 = vmatprep.subr.bf16.mxu0 %v285_v16 }
  0x4a   :  { %313 = vmatpush3.bf16.msra.mxu1 %v285_v16  ;;  %288 = vmatpush3.bf16.msra.mxu0 %v285_v16 }
  0x4b   :  { %306 = vmatprep.subr.bf16.mxu1 %v289_v19  ;;  %290 = vmatprep.subr.bf16.mxu0 %v289_v19 }
  0x4e   :  { %314 = vmatpush3.bf16.msra.mxu1 %v289_v19  ;;  %292 = vmatpush3.bf16.msra.mxu0 %v289_v19 }
  0x4f   :  { %307 = vmatprep.subr.bf16.mxu1 %v293_v22  ;;  %294 = vmatprep.subr.bf16.mxu0 %v293_v22 }
  0x52   :  { %315 = vmatpush3.bf16.msra.mxu1 %v293_v22  ;;  %296 = vmatpush3.bf16.msra.mxu0 %v293_v22 }
  0x53   :  { %308 = vmatprep.subr.bf16.mxu1 %v297_v25  ;;  %298 = vmatprep.subr.bf16.mxu0 %v297_v25 }
  0x56   :  { %316 = vmatpush3.bf16.msra.mxu1 %v297_v25  ;;  %300 = vmatpush3.bf16.msra.mxu0 %v297_v25 }
  0x59   :  { %264 = vmatmul.mubr.f32.vlgmr.msra.gmra.mrb[0].mxu1 %v59_v26  ;;  %261 = vmatmul.mubr.f32.vlgmr.msra.gmra.mrb[0].mxu0 %v57_v27 }
  0x5a   :  { %266 = vmatprep.mubr.f32.mxu1 %v60_v28 }
  0x5d   :  { %267 = vmatmul.mubr.f32.gmra.mrb[2].mxu1 %v61_v29 }
 0x12c   :  { %v265_v33 = vpop.f32.mrb[0].mxu1  ;;  %v262_v34 = vpop.f32.mrb[0].mxu0 }
 0x12d   :  { %v179_v35 = vadd.f32 %v265_v33, %v173_v30  ;;  %v154_v36 = vpop.f32.mrb[1].mxu1  ;;  %v177_v37 = vadd.f32 %v262_v34, %v174_v31  ;;  %v144_v38 = vpop.f32.mrb[1].mxu0 }
 0x12e   :  { %v178_v39 = vadd.f32 %v175_v32, %v154_v36  ;;  %v176_v40 = vadd.f32 %v173_v30, %v144_v38 }
 0x12f   :  { %185 = vst [vmem:[#allocation8 + $0x18] sm:$0xff] %v179_v35  ;;  %183 = vst [vmem:[#allocation8 + $0x8] sm:$0xff] %v177_v37 }
 0x130   :  { %184 = vst [vmem:[#allocation8 + $0x10] sm:$0x1] %v178_v39  ;;  %182 = vst [vmem:[#allocation8] sm:$0xff] %v176_v40  ;;  %v268_v41 = vpop.f32.mrb[2].mxu1 }
 0x131   :  { %v181_v42 = vadd.f32 %v268_v41, %v175_v32  ;;  %v164_v43 = vpop.f32.mrb[3].mxu1 }
 0x132   :  { %v180_v44 = vadd.f32 %v174_v31, %v164_v43 }
 0x133   :  { %187 = vst [vmem:[#allocation8 + $0x28] sm:$0x1] %v181_v42 }
 0x134   :  { %186 = vst [vmem:[#allocation8 + $0x20] sm:$0xff] %v180_v44 }
 0x135   :  { %400 = shalt.err (!%p397_p0)
}
 0x136   :  { %s401_s27 = scalar_lea.hbm %s513_s3, 768 }
 0x137   :  { %p402_p1 = scmp.ne.s32.totalorder %s513_s3, %s401_s27  ;;  %p405_p2 = scmp.lt.u32.totalorder %s401_s27, %s513_s3 }
 0x139   :  { %p407_p3 = pnand %p405_p2, %p402_p1 }
 0x13b   :  { %410 = shalt.err (!%p407_p3)
}
 0x13c   :  { %199 = dma.vmem_to_hbm [thread:$0]  %s194_s21, 768, %s513_s3, [#allocation4], %s419_s24, %s419_s24, %s420_s25  }
 0x13d   :  { %415 = dma.done.wait [#allocation4], 768  }
 0x13e   :  { %416 = vsyncadd [#allocation4], 4294966528 }
 0x13f   :  { %203 = vsyncpa [#allocation3], 1 }
 0x140   :  { %204 = vsyncpa [#allocation6], 1 }
 0x141   :  { %205 = vsyncpa [#allocation4], 1 }

</bundles_post_ra>
